<compile_context>
chip_gen: v7x
topology: tpu7x:2x2x1
jax: 0.10.0
libtpu: 0.0.40
codegen_flags: <defaults>
</compile_context>

<pallas_src>
import functools
import math

import jax
import jax.numpy as jnp
from jax import lax
from jax.experimental import pallas as pl
from jax.experimental.pallas import tpu as pltpu

# Large finite negative instead of -inf: identical softmax for partially
# masked rows (exp underflows to exactly 0), but avoids NaN (inf-inf, 0/0)
# when an entire row is masked out.
_MASK_FILL = -1e30


def _vmem_capacity_bytes():
    """Physical VMEM of the current TPU generation (conservative fallback)."""
    try:
        info = pltpu.get_tpu_info()
        for name in ("vmem_capacity_bytes", "vmem_size_bytes", "vmem_bytes"):
            val = getattr(info, name, None)
            if val:
                return int(val)
    except Exception:
        pass
    # Unknown -> assume the smallest (v7x, 64 MiB per TC) so budgets are safe
    # on every generation.
    return 64 * 1024 * 1024


def _pick_query_tile(length, score_budget_bytes):
    """Largest query tile TQ (multiple of 8, dividing `length`, capped at 1024)
    whose f32 (TQ, L) score tile fits `score_budget_bytes`."""
    if length <= 1024 and length * length * 4 <= score_budget_bytes:
        return length
    best = None
    for tq in range(8, min(length, 1024) + 1, 8):
        if length % tq == 0 and tq * length * 4 <= score_budget_bytes:
            best = tq
    if best is not None:
        return best
    # No multiple-of-8 divisor fits the budget: degrade gracefully to the
    # smallest multiple-of-8 divisor instead of a full-length tile.
    for tq in range(8, length, 8):
        if length % tq == 0:
            return tq
    # TODO(synk): prime / non-8-divisible lengths fall back to one full-length
    # tile; padding the sequence would be needed to tile those cleanly.
    return length


def _attention_body(q, k, v, out_ref, score_ref, scale, mask_fn, compute_dtype):
    """Shared body: scaled q@k^T, (optional) mask, softmax, p@v, stores."""
    qc = (q * scale).astype(compute_dtype)   # fold 1/sqrt(D) into (TQ, D) tile
    kc = k.astype(compute_dtype)

    # q @ k^T as a contraction over the last dims: feeds the MXU directly,
    # no materialized transpose of k.
    s = lax.dot_general(qc, kc, (((1,), (1,)), ((), ())),
                        preferred_element_type=jnp.float32)            # (TQ, L)
    if mask_fn is not None:
        s = mask_fn(s)

    # Numerically stable softmax over the key axis (matches torch.softmax).
    m = jnp.max(s, axis=-1, keepdims=True)
    e = jnp.exp(s - m)
    denom = jnp.sum(e, axis=-1, keepdims=True)
    # approx=True (EUP vrcp) is essentially free; kept exact for tight parity
    # with torch.softmax under the 1e-4 asserts below.
    p = e * pl.reciprocal(denom, approx=False)                          # (TQ, L)

    score_ref[...] = p.astype(score_ref.dtype)
    out_ref[...] = jnp.dot(p.astype(compute_dtype), v.astype(compute_dtype),
                           preferred_element_type=jnp.float32).astype(out_ref.dtype)


def _sdpa_kernel(q_ref, k_ref, v_ref, out_ref, score_ref,
                 *, scale, tq, causal, compute_dtype):
    # Blocks (leading batch/head dims squeezed by the BlockSpecs):
    #   q_ref: (TQ, D), k_ref/v_ref: (L, D), out_ref: (TQ, D), score_ref: (TQ, L)
    mask_fn = None
    if causal:
        def mask_fn(s):
            # Generate the causal mask in-kernel: no HBM mask traffic at all.
            row0 = pl.multiple_of(pl.program_id(2) * tq, tq)
            qi = lax.broadcasted_iota(jnp.int32, s.shape, 0) + row0
            ki = lax.broadcasted_iota(jnp.int32, s.shape, 1)
            return jnp.where(ki > qi, jnp.float32(_MASK_FILL), s)
    _attention_body(q_ref[...], k_ref[...], v_ref[...], out_ref, score_ref,
                    scale, mask_fn, compute_dtype)


def _sdpa_masked_kernel(q_ref, k_ref, v_ref, m_ref, out_ref, score_ref,
                        *, scale, tq, resident, compute_dtype):
    if resident:
        # m_ref is the whole (L, L) mask, VMEM-resident for the entire grid
        # (constant index_map) -- slice the (TQ, L) row window in-kernel.
        row0 = pl.multiple_of(pl.program_id(2) * tq, tq)
        mtile = m_ref[pl.ds(row0, tq), :]
    else:
        # m_ref is a streamed (TQ, L) int8 slab.
        mtile = m_ref[...]

    def mask_fn(s):
        return jnp.where(mtile == 0, jnp.float32(_MASK_FILL), s)

    _attention_body(q_ref[...], k_ref[...], v_ref[...], out_ref, score_ref,
                    scale, mask_fn, compute_dtype)


def scale_dot_product_attention(q, k, v, mask=None, *, causal=False,
                                score_dtype=None, compute_dtype=None):
    """Pallas equivalent of ScaleDotProductAttention.forward -> (out, score).

    score_dtype:   dtype of the returned (B, H, L, L) probabilities.  Defaults
                   to q.dtype (exact torch parity); bf16 halves the dominant
                   HBM-writeback traffic at large L.
    compute_dtype: dtype of the MXU matmul operands (f32 accumulation always).
                   Defaults to q.dtype; bf16 gives 2-4x MXU throughput once
                   the kernel is no longer writeback-bound.
    causal:        if True (and mask is None), apply a causal mask generated
                   in-kernel, with no mask operand streamed from HBM.
    """
    B, H, L, D = k.shape
    scale = 1.0 / math.sqrt(D)

    score_dtype = jnp.dtype(score_dtype) if score_dtype is not None else q.dtype
    compute_dtype = jnp.dtype(compute_dtype) if compute_dtype is not None else q.dtype

    # Generation-aware budgets: v7x has 64 MiB VMEM per TensorCore; v5e/v6e
    # have 128 MiB, so they can afford bigger score tiles and a higher limit.
    vmem_cap = _vmem_capacity_bytes()
    small_vmem = vmem_cap <= 64 * 1024 * 1024
    score_budget = (4 if small_vmem else 16) * 1024 * 1024
    vmem_limit = (44 if small_vmem else 96) * 1024 * 1024

    tq = _pick_query_tile(L, score_budget)
    n_q = L // tq if L % tq == 0 else 1

    q_spec = pl.BlockSpec((None, None, tq, D), lambda b, h, i: (b, h, i, 0))
    kv_spec = pl.BlockSpec((None, None, L, D), lambda b, h, i: (b, h, 0, 0))
    out_spec = pl.BlockSpec((None, None, tq, D), lambda b, h, i: (b, h, i, 0))
    score_spec = pl.BlockSpec((None, None, tq, L), lambda b, h, i: (b, h, i, 0))

    out_shapes = (
        jax.ShapeDtypeStruct((B, H, L, D), q.dtype),
        jax.ShapeDtypeStruct((B, H, L, L), score_dtype),
    )
    # Query-tile axis marked "arbitrary" so megacore sharding (v7x) happens on
    # batch*head: each core keeps disjoint, resident K/V instead of both cores
    # streaming the same (L, D) tiles.
    compiler_params = pltpu.CompilerParams(
        dimension_semantics=("parallel", "parallel", "arbitrary"),
        vmem_limit_bytes=vmem_limit,
    )

    if mask is None:
        return pl.pallas_call(
            functools.partial(_sdpa_kernel, scale=scale, tq=tq, causal=causal,
                              compute_dtype=compute_dtype),
            out_shape=out_shapes,
            grid_spec=pltpu.PrefetchScalarGridSpec(
                num_scalar_prefetch=0,
                grid=(B, H, n_q),
                in_specs=[q_spec, kv_spec, kv_spec],
                out_specs=[out_spec, score_spec],
            ),
            compiler_params=compiler_params,
        )(q, k, v)

    # Generic mask path.  Keep the mask at its natural broadcast shape over
    # (batch, head) -- never materialize a (B, H, L, L) copy -- and stream it
    # as int8 (4x less DMA than int32).  Only the trailing (query, key) dims
    # are expanded to (L, L).
    m = jnp.asarray(mask)
    m = m.reshape((1,) * (4 - m.ndim) + m.shape)
    bm, hm = m.shape[0], m.shape[1]
    m = jnp.broadcast_to(m, (bm, hm, L, L)).astype(jnp.int8)

    # If the mask is shared across batch and head and fits VMEM (with its
    # pipeline buffer), keep the whole (L, L) block resident for the entire
    # grid instead of re-DMA'ing the same slabs for every (b, h).
    mask_resident_budget = (4 if small_vmem else 16) * 1024 * 1024
    resident = (bm == 1 and hm == 1 and 2 * L * L <= mask_resident_budget)

    if resident:
        mask_spec = pl.BlockSpec((None, None, L, L), lambda b, h, i: (0, 0, 0, 0))
    else:
        mask_spec = pl.BlockSpec(
            (None, None, tq, L),
            lambda b, h, i: (b if bm > 1 else 0, h if hm > 1 else 0, i, 0),
        )

    return pl.pallas_call(
        functools.partial(_sdpa_masked_kernel, scale=scale, tq=tq,
                          resident=resident, compute_dtype=compute_dtype),
        out_shape=out_shapes,
        grid_spec=pltpu.PrefetchScalarGridSpec(
            num_scalar_prefetch=0,
            grid=(B, H, n_q),
            in_specs=[q_spec, kv_spec, kv_spec, mask_spec],
            out_specs=[out_spec, score_spec],
        ),
        compiler_params=compiler_params,
    )(q, k, v, m)


if __name__ == "__main__":
    # Small shapes consistent with the module: (batch, head, length, d_head).
    B, H, L, D = 2, 4, 128, 64
    key = jax.random.PRNGKey(0)
    kq, kk, kv = jax.random.split(key, 3)
    q = jax.random.normal(kq, (B, H, L, D), dtype=jnp.float32)
    k = jax.random.normal(kk, (B, H, L, D), dtype=jnp.float32)
    v = jax.random.normal(kv, (B, H, L, D), dtype=jnp.float32)

    # Plain-JAX references.
    s_ref = jnp.einsum("bhld,bhmd->bhlm", q, k) / math.sqrt(D)
    p_ref = jax.nn.softmax(s_ref, axis=-1)
    o_ref = jnp.einsum("bhlm,bhmd->bhld", p_ref, v)

    # 1) Unmasked path.
    out, score = scale_dot_product_attention(q, k, v)
    jax.block_until_ready((out, score))
    assert jnp.allclose(score, p_ref, atol=1e-4, rtol=1e-4), "score mismatch"
    assert jnp.allclose(out, o_ref, atol=1e-4, rtol=1e-4), "output mismatch"

    # Causal reference.
    tril = jnp.tril(jnp.ones((L, L), dtype=jnp.int32))
    s_c = jnp.where(tril[None, None] == 0, -jnp.inf, s_ref)
    p_c = jax.nn.softmax(s_c, axis=-1)
    o_c = jnp.einsum("bhlm,bhmd->bhld", p_c, v)

    # 2) In-kernel causal mask (no mask operand streamed from HBM).
    out_c, score_c = scale_dot_product_attention(q, k, v, causal=True)
    jax.block_until_ready((out_c, score_c))
    assert jnp.allclose(score_c, p_c, atol=1e-4, rtol=1e-4), "causal score mismatch"
    assert jnp.allclose(out_c, o_c, atol=1e-4, rtol=1e-4), "causal output mismatch"

    # 3) Explicit (1, 1, L, L) mask -> VMEM-resident mask path.
    out_r, score_r = scale_dot_product_attention(q, k, v, mask=tril[None, None])
    jax.block_until_ready((out_r, score_r))
    assert jnp.allclose(score_r, p_c, atol=1e-4, rtol=1e-4), "resident-mask score mismatch"
    assert jnp.allclose(out_r, o_c, atol=1e-4, rtol=1e-4), "resident-mask output mismatch"

    # 4) Per-batch key-padding mask (B, 1, 1, L) -> streamed tiled mask path.
    bmask = (jax.random.uniform(jax.random.PRNGKey(1), (B, 1, 1, L)) > 0.2).astype(jnp.int32)
    out_b, score_b = scale_dot_product_attention(q, k, v, mask=bmask)
    jax.block_until_ready((out_b, score_b))
    s_b = jnp.where(bmask == 0, -jnp.inf, s_ref)
    p_b = jax.nn.softmax(s_b, axis=-1)
    o_b = jnp.einsum("bhlm,bhmd->bhld", p_b, v)
    assert jnp.allclose(score_b, p_b, atol=1e-4, rtol=1e-4), "batch-mask score mismatch"
    assert jnp.allclose(out_b, o_b, atol=1e-4, rtol=1e-4), "batch-mask output mismatch"

    # 5) bf16 score output (halves the dominant HBM writeback at large L).
    out_h, score_h = scale_dot_product_attention(q, k, v, score_dtype=jnp.bfloat16)
    jax.block_until_ready((out_h, score_h))
    assert score_h.dtype == jnp.bfloat16
    assert jnp.allclose(score_h.astype(jnp.float32), p_ref, atol=1e-2, rtol=1e-2), \
        "bf16 score mismatch"
    assert jnp.allclose(out_h, o_ref, atol=1e-4, rtol=1e-4), "bf16-score output mismatch"

    print("KERNEL_OK")
</pallas_src>

<mosaic_0001>
module attributes {stable_mosaic.version = 11 : i64} {
  func.func @_sdpa_kernel(%arg0: i32, %arg1: i32, %arg2: i32, %arg3: memref<1x1x128x64xf32, #tpu.memory_space<vmem>>, %arg4: memref<1x1x128x64xf32, #tpu.memory_space<vmem>>, %arg5: memref<1x1x128x64xf32, #tpu.memory_space<vmem>>, %arg6: memref<1x1x128x64xf32, #tpu.memory_space<vmem>>, %arg7: memref<1x1x128x128xf32, #tpu.memory_space<vmem>>) attributes {dimension_semantics = [#tpu.dimension_semantics<parallel>, #tpu.dimension_semantics<parallel>, #tpu.dimension_semantics<arbitrary>], iteration_bounds = array<i64: 2, 4, 1>, scalar_prefetch = 0 : i64, scratch_operands = 0 : i64, tpu.core_type = #tpu.core_type<tc>, window_params = [{transform_indices = @transform_0, window_bounds = array<i64: 1, 1, 128, 64>}, {transform_indices = @transform_1, window_bounds = array<i64: 1, 1, 128, 64>}, {transform_indices = @transform_2, window_bounds = array<i64: 1, 1, 128, 64>}, {transform_indices = @transform_3, window_bounds = array<i64: 1, 1, 128, 64>}, {transform_indices = @transform_4, window_bounds = array<i64: 1, 1, 128, 128>}]} {
    %c0 = arith.constant 0 : index
    %c0_0 = arith.constant 0 : index
    %c0_1 = arith.constant 0 : index
    %c0_2 = arith.constant 0 : index
    %0 = vector.load %arg3[%c0, %c0_0, %c0_1, %c0_2] : memref<1x1x128x64xf32, #tpu.memory_space<vmem>>, vector<1x1x128x64xf32>
    %1 = vector.shape_cast %0 : vector<1x1x128x64xf32> to vector<128x64xf32>
    %c0_3 = arith.constant 0 : index
    %c0_4 = arith.constant 0 : index
    %c0_5 = arith.constant 0 : index
    %c0_6 = arith.constant 0 : index
    %2 = vector.load %arg4[%c0_3, %c0_4, %c0_5, %c0_6] : memref<1x1x128x64xf32, #tpu.memory_space<vmem>>, vector<1x1x128x64xf32>
    %3 = vector.shape_cast %2 : vector<1x1x128x64xf32> to vector<128x64xf32>
    %c0_7 = arith.constant 0 : index
    %c0_8 = arith.constant 0 : index
    %c0_9 = arith.constant 0 : index
    %c0_10 = arith.constant 0 : index
    %4 = vector.load %arg5[%c0_7, %c0_8, %c0_9, %c0_10] : memref<1x1x128x64xf32, #tpu.memory_space<vmem>>, vector<1x1x128x64xf32>
    %5 = vector.shape_cast %4 : vector<1x1x128x64xf32> to vector<128x64xf32>
    %cst = arith.constant 1.250000e-01 : f32
    %6 = vector.broadcast %cst : f32 to vector<128x64xf32>
    %7 = arith.mulf %1, %6 : vector<128x64xf32>
    %cst_11 = arith.constant dense<0.000000e+00> : vector<128x128xf32>
    %8 = tpu.matmul %7, %3, %cst_11 {dimension_numbers = #tpu.dot_dimension_numbers<[1], [1], [0], [0], [0, 0, 1, 0], [], []>} : vector<128x64xf32>, vector<128x64xf32>, vector<128x128xf32> -> vector<128x128xf32>
    %cst_12 = arith.constant dense<0xFF800000> : vector<128xf32>
    %9 = vector.multi_reduction <maximumf>, %8, %cst_12 [1] : vector<128x128xf32> to vector<128xf32>
    %10 = vector.shape_cast %9 : vector<128xf32> to vector<128x1xf32>
    %11 = vector.broadcast %10 : vector<128x1xf32> to vector<128x128xf32>
    %12 = arith.subf %8, %11 : vector<128x128xf32>
    %13 = math.exp %12 : vector<128x128xf32>
    %cst_13 = arith.constant dense<0.000000e+00> : vector<128xf32>
    %14 = vector.multi_reduction <add>, %13, %cst_13 [1] : vector<128x128xf32> to vector<128xf32>
    %15 = vector.shape_cast %14 : vector<128xf32> to vector<128x1xf32>
    %16 = tpu.reciprocal %15 : vector<128x1xf32> -> vector<128x1xf32>
    %17 = vector.broadcast %16 : vector<128x1xf32> to vector<128x128xf32>
    %18 = arith.mulf %13, %17 : vector<128x128xf32>
    %c0_14 = arith.constant 0 : index
    %c0_15 = arith.constant 0 : index
    %c0_16 = arith.constant 0 : index
    %c0_17 = arith.constant 0 : index
    %19 = vector.load %arg7[%c0_14, %c0_15, %c0_16, %c0_17] : memref<1x1x128x128xf32, #tpu.memory_space<vmem>>, vector<1x1x128x128xf32>
    %20 = vector.shape_cast %19 : vector<1x1x128x128xf32> to vector<128x128xf32>
    %21 = vector.shape_cast %18 : vector<128x128xf32> to vector<1x1x128x128xf32>
    tpu.vector_store %arg7[%c0_14, %c0_15, %c0_16, %c0_17], %21 {strides = array<i32>} : memref<1x1x128x128xf32, #tpu.memory_space<vmem>>, vector<1x1x128x128xf32>,
    %cst_18 = arith.constant dense<0.000000e+00> : vector<128x64xf32>
    %22 = tpu.matmul %18, %5, %cst_18 {dimension_numbers = #tpu.dot_dimension_numbers<[1], [0], [0], [1], [0, 0, 1, 1], [], []>} : vector<128x128xf32>, vector<128x64xf32>, vector<128x64xf32> -> vector<128x64xf32>
    %c0_19 = arith.constant 0 : index
    %c0_20 = arith.constant 0 : index
    %c0_21 = arith.constant 0 : index
    %c0_22 = arith.constant 0 : index
    %23 = vector.load %arg6[%c0_19, %c0_20, %c0_21, %c0_22] : memref<1x1x128x64xf32, #tpu.memory_space<vmem>>, vector<1x1x128x64xf32>
    %24 = vector.shape_cast %23 : vector<1x1x128x64xf32> to vector<128x64xf32>
    %25 = vector.shape_cast %22 : vector<128x64xf32> to vector<1x1x128x64xf32>
    tpu.vector_store %arg6[%c0_19, %c0_20, %c0_21, %c0_22], %25 {strides = array<i32>} : memref<1x1x128x64xf32, #tpu.memory_space<vmem>>, vector<1x1x128x64xf32>,
    return
  }
  func.func @transform_0(%arg0: i32, %arg1: i32, %arg2: i32) -> (i32, i32, i32, i32) {
    %c0_i32 = arith.constant 0 : i32
    %c0_i32_0 = arith.constant 0 : i32
    return %arg0, %arg1, %arg2, %c0_i32 : i32, i32, i32, i32
  }
  func.func @transform_1(%arg0: i32, %arg1: i32, %arg2: i32) -> (i32, i32, i32, i32) {
    %c0_i32 = arith.constant 0 : i32
    %c0_i32_0 = arith.constant 0 : i32
    %c0_i32_1 = arith.constant 0 : i32
    return %arg0, %arg1, %c0_i32, %c0_i32_0 : i32, i32, i32, i32
  }
  func.func @transform_2(%arg0: i32, %arg1: i32, %arg2: i32) -> (i32, i32, i32, i32) {
    %c0_i32 = arith.constant 0 : i32
    %c0_i32_0 = arith.constant 0 : i32
    %c0_i32_1 = arith.constant 0 : i32
    return %arg0, %arg1, %c0_i32, %c0_i32_0 : i32, i32, i32, i32
  }
  func.func @transform_3(%arg0: i32, %arg1: i32, %arg2: i32) -> (i32, i32, i32, i32) {
    %c0_i32 = arith.constant 0 : i32
    %c0_i32_0 = arith.constant 0 : i32
    return %arg0, %arg1, %arg2, %c0_i32 : i32, i32, i32, i32
  }
  func.func @transform_4(%arg0: i32, %arg1: i32, %arg2: i32) -> (i32, i32, i32, i32) {
    %c0_i32 = arith.constant 0 : i32
    %c0_i32_0 = arith.constant 0 : i32
    return %arg0, %arg1, %arg2, %c0_i32 : i32, i32, i32, i32
  }
}

</mosaic_0001>

<bundles_post_ra>
// kernel: tpu_custom_call.1
= control target key start
LH: loop header
LB: loop body
LE: loop exit
PB: predicated region body
PF: predicated region fallthrough
CT: control target
= control target key end

     0   :  { %10 = vsyncpa [#allocation3], 0  ;;  %s2203_s0 = inlined_call_operand.vmem [shape: f32[2,4,128,64], index: 0, kind: input, shape index: {}]   ;;  %s2204_s1 = inlined_call_operand.vmem [shape: f32[2,4,128,64], index: 1, kind: input, shape index: {}]   ;;  %s2205_s2 = inlined_call_operand.vmem [shape: f32[2,4,128,64], index: 2, kind: input, shape index: {}]   ;;  %s2206_s3 = inlined_call_operand.vmem [shape: f32[2,4,128,64], index: 3, kind: output, shape index: {0}]   ;;  %s2207_s4 = inlined_call_operand.hbm [shape: f32[2,4,128,128], index: 4, kind: output, shape index: {1}]  }
   0x1   :  { %12 = vsyncpa [#allocation3 + $0x1], 0  ;;  %s1771_s15 = smov 0   ;;  %s1773_s16 = smov 0  }
   0x2   :  { %s1775_s17 = smov 0   ;;  %s1777_s18 = smov 0  }
   0x3   :  { %s1779_s19 = smov 0   ;;  %s1781_s20 = smov 0  }
   0x4   :  { %s1783_s21 = smov 0   ;;  %s1785_s22 = smov 0  }
   0x5 LB: > { %s1198_s23 = sadd.s32 4294967295, %s1741_s22   ;;  %s1199_s24 = sadd.s32 4294967294, %s1741_s22   ;;  %s1741_s22 = sphi %s1785_s22, %s18_s22   ;;  %s1737_s21 = sphi %s1783_s21, %s2218_s21   ;;  %s1733_s20 = sphi %s1781_s20, %s2217_s20   ;;  %s1729_s19 = sphi %s1779_s19, %s2216_s19   ;;  %s1725_s18 = sphi %s1777_s18, %s2215_s18   ;;  %s1721_s17 = sphi %s1775_s17, %s2214_s17   ;;  %s1717_s16 = sphi %s1773_s16, %s2213_s16   ;;  %s1713_s15 = sphi %s1771_s15, %s2212_s15  }
   0x6   : > { %s33_s25 = sadd.s32 1, %s1733_s20  ;;  %s37_s26 = sadd.s32 1, %s1737_s21 }
   0x7   : > { %p35_p0 = scmp.ge.s32.totalorder %s33_s25, 4  ;;  %p174_p1 = scmp.ne.s32.totalorder %s1721_s17, %s1717_s16 }
   0x8   : > { %p175_p2 = scmp.eq.s32.totalorder %s1198_s23, 7  ;;  %p180_p5 = scmp.ne.s32.totalorder %s1717_s16, %s1713_s15 }
   0x9   : > { %s2220_s25 = smov (%p35_p0, %s33_s25), 0  ;;  %s2222_s26 = smov (!%p35_p0, %s37_s26), %s1737_s21 }
   0xa   : > { %s158_s27 = ssub.s32 %s1733_s20, %s2220_s25  ;;  %p1822_p3 = por %p175_p2, %p174_p1 }
   0xb   : > { %p39_p4 = scmp.ge.s32.totalorder %s2222_s26, 2  ;;  %p181_p6 = scmp.eq.s32.totalorder %s1199_s24, 7 }
   0xc   : > { %p1202_p7 = scmp.ge.s32.totalorder %s1741_s22, 1  ;;  %p240_p9 = scmp.lt.s32.totalorder %s1741_s22, 9 }
   0xd   : > { %s2224_s26 = smov (%p39_p4, %s2222_s26), 0  ;;  %p1831_p8 = por %p181_p6, %p180_p5 }
   0xe   : > { %s157_s30 = ssub.s32 %s1737_s21, %s2224_s26  ;;  %s164_s5 = sadd.s32 1, %s1721_s17 }
   0xf   : > { %s159_s6 = sor.u32 %s158_s27, %s157_s30  ;;  %p241_p10 = pnand %p1202_p7, %p240_p9 }
  0x10   : > { %p162_p11 = scmp.eq.s32.totalorder %s159_s6, 0  ;;  %p306_p12 = scmp.lt.s32.totalorder (!%p241_p10), %s1729_s19, 1  ;;  %vm416_vm0 = vcmask (!%p241_p10), 523264  }
  0x11   : > { %244 = sbr.rel (%p241_p10) target bundleno = 869 (0x365), region = 32  ;;  %p308_p13 = scmp.lt.s32.totalorder (!%p241_p10), %s1725_s18, 3  ;;  %vm1856_vm1 = vmpackc.low (!%p241_p10), %vm416_vm0, %vm416_vm0 }
  0x12   : > { %s1840_s7 = scalar_select %p162_p11, %s1721_s17, %s164_s5  }
  0x13   : > { %s1249_s14 = sshll.u32 (!%p241_p10), %s1725_s18, 4  ;;  %s1250_s23 = sshll.u32 (!%p241_p10), %s1729_s19, 6 }
  0x18   : > { %s307_s8 = scalar_select %p306_p12, %s1729_s19, 1 }
  0x19   : > { %s309_s9 = scalar_select %p308_p13, %s1725_s18, 3 }
  0x1a   : > { %s1205_s10 = sshll.u32 %s307_s8, 6  ;;  %s1743_s18 = smov [#allocation2]  }
  0x1b   : > { %s1204_s11 = sshll.u32 %s309_s9, 4  ;;  %s1651_s19 = sshll.u32 %s1743_s18, 4  ;;  %s1652_s19 = int_to_ptr.vmem [resolvable:$false] %s1651_s19 }
  0x1c   : > { %s315_s12 = sadd.s32 %s1205_s10, %s1204_s11  ;;  %s302_s10 = sand.u32 1, %s1717_s16  }
  0x1d   : > { %s1846_s13 = sshll.u32 %s315_s12, 3  ;;  %s1203_s11 = sshll.u32 %s302_s10, 7 }
  0x1e   : > { %s1852_s24 = scalar_lea.vmem %s2204_s1, %s1846_s13  ;;  %s1868_s5 = scalar_lea.vmem %s2203_s0, %s1846_s13 }
  0x1f   : > { %v368_v1 = vld [vmem:[%s1852_s24] sm:$0xff]  ;;  %v369_v2 = vld [vmem:[%s1852_s24 + $0x8] sm:$0xff]  ;;  %v370_v3 = vld [vmem:[%s1852_s24 + $0x10] sm:$0xff]  ;;  %s1986_s9 = scalar_lea.vmem %s2205_s2, %s1846_s13  ;;  %s2068_s12 = scalar_lea.vmem [#allocation2], %s1203_s11 }
  0x20   : > { %v1430_v4 = vpack.c.bf16 %v369_v2, %v368_v1  ;;  %v371_v5 = vld [vmem:[%s1852_s24 + $0x18] sm:$0xff]  ;;  %v352_v7 = vld [vmem:[%s1868_s5] sm:$0xff]  ;;  %v373_v9 = vld [vmem:[%s1852_s24 + $0x28] sm:$0xff]  ;;  %s1014_s30 = sshll.u32 %s2068_s12, 4  ;;  %s2109_s30 = int_to_ptr.vmem [resolvable:$true] %s1014_s30 }
  0x21   : > { %v1436_v6 = vpack.c.bf16 %v371_v5, %v370_v3  ;;  %v372_v8 = vld [vmem:[%s1852_s24 + $0x20] sm:$0xff]  ;;  %v400_v10 = vmul.f32 0.125, %v352_v7  ;;  %v374_v12 = vld [vmem:[%s1852_s24 + $0x30] sm:$0xff]  ;;  %v375_v13 = vld [vmem:[%s1852_s24 + $0x38] sm:$0xff]  ;;  %s1647_s11 = scalar_lea.vmem %s2109_s30, 2048  ;;  %p1654_p4 = scmp.lt.s32.totalorder %s2109_s30, %s1652_s19 }
  0x22   : > { %1432 = vmatprep.subr.msk.bf16.mxu0 %vm1856_vm1, %v1430_v4  ;;  %v1442_v11 = vpack.c.bf16 %v373_v9, %v372_v8  ;;  %v1448_v14 = vpack.c.bf16 %v375_v13, %v374_v12  ;;  %v376_v15 = vld [vmem:[%s1852_s24 + $0x40] sm:$0xff]  ;;  %v377_v16 = vld [vmem:[%s1852_s24 + $0x48] sm:$0xff]  ;;  %v378_v18 = vld [vmem:[%s1852_s24 + $0x50] sm:$0xff]  ;;  %p1648_p0 = scmp.ne.s32.totalorder %s2109_s30, %s1647_s11 }
  0x23   : > { %1435 = vmatpush3.bf16.xpose.msk.msra.mxu0 %vm1856_vm1, %v1430_v4  ;;  %1350 = vmatprep.mubr.msk.f32.mxu0 %vm416_vm0, %v400_v10  ;;  %v1454_v17 = vpack.c.bf16 %v377_v16, %v376_v15  ;;  %v379_v19 = vld [vmem:[%s1852_s24 + $0x58] sm:$0xff]  ;;  %v380_v21 = vld [vmem:[%s1852_s24 + $0x60] sm:$0xff]  ;;  %v381_v22 = vld [vmem:[%s1852_s24 + $0x68] sm:$0xff] }
  0x24   : > { %1438 = vmatprep.subr.msk.bf16.mxu0 %vm1856_vm1, %v1436_v6  ;;  %v1460_v20 = vpack.c.bf16 %v379_v19, %v378_v18  ;;  %v1466_v23 = vpack.c.bf16 %v381_v22, %v380_v21  ;;  %v382_v24 = vld [vmem:[%s1852_s24 + $0x70] sm:$0xff]  ;;  %v383_v25 = vld [vmem:[%s1852_s24 + $0x78] sm:$0xff]  ;;  %v353_v27 = vld [vmem:[%s1868_s5 + $0x8] sm:$0xff]  ;;  %s1011_s24 = sadd.s32 %s1250_s23, %s1249_s14  ;;  %p1649_p1 = pnand %p1648_p0, %p1822_p3 }
  0x25   : > { %v1472_v26 = vpack.c.bf16 %v383_v25, %v382_v24  ;;  %v354_v28 = vld [vmem:[%s1868_s5 + $0x10] sm:$0xff]  ;;  %v401_v29 = vmul.f32 0.125, %v353_v27  ;;  %v355_v31 = vld [vmem:[%s1868_s5 + $0x18] sm:$0xff]  ;;  %v356_v32 = vld [vmem:[%s1868_s5 + $0x20] sm:$0xff]  ;;  %s1251_s27 = sshll.u32 %s1011_s24, 7 }
  0x26   : > { %v402_v30 = vmul.f32 0.125, %v354_v28  ;;  %v403_v33 = vmul.f32 0.125, %v355_v31  ;;  %v404_v34 = vmul.f32 0.125, %v356_v32  ;;  %v357_v35 = vld [vmem:[%s1868_s5 + $0x28] sm:$0xff]  ;;  %v358_v36 = vld [vmem:[%s1868_s5 + $0x30] sm:$0xff]  ;;  %v359_v39 = vld [vmem:[%s1868_s5 + $0x38] sm:$0xff]  ;;  %s2107_s8 = scalar_lea.hbm %s2207_s4, %s1251_s27  ;;  %p1650_p2 = pneg %p1649_p1 }
  0x27   : > { %v405_v37 = vmul.f32 0.125, %v357_v35  ;;  %v406_v38 = vmul.f32 0.125, %v358_v36  ;;  %v360_v40 = vld [vmem:[%s1868_s5 + $0x40] sm:$0xff]  ;;  %v407_v41 = vmul.f32 0.125, %v359_v39  ;;  %v361_v43 = vld [vmem:[%s1868_s5 + $0x48] sm:$0xff]  ;;  %v362_v44 = vld [vmem:[%s1868_s5 + $0x50] sm:$0xff] }
  0x28   : > { %v408_v42 = vmul.f32 0.125, %v360_v40  ;;  %v409_v45 = vmul.f32 0.125, %v361_v43  ;;  %v410_v46 = vmul.f32 0.125, %v362_v44  ;;  %v363_v47 = vld [vmem:[%s1868_s5 + $0x58] sm:$0xff]  ;;  %v364_v48 = vld [vmem:[%s1868_s5 + $0x60] sm:$0xff]  ;;  %v365_v51 = vld [vmem:[%s1868_s5 + $0x68] sm:$0xff] }
  0x29   : > { %v411_v49 = vmul.f32 0.125, %v363_v47  ;;  %v412_v50 = vmul.f32 0.125, %v364_v48  ;;  %v366_v52 = vld [vmem:[%s1868_s5 + $0x70] sm:$0xff]  ;;  %v413_v53 = vmul.f32 0.125, %v365_v51  ;;  %v367_v55 = vld [vmem:[%s1868_s5 + $0x78] sm:$0xff]  ;;  %v384_v9 = vld [vmem:[%s1986_s9] sm:$0xff] }
  0x2a   : > { %v414_v54 = vmul.f32 0.125, %v366_v52  ;;  %v415_v56 = vmul.f32 0.125, %v367_v55  ;;  %v385_v10 = vld [vmem:[%s1986_s9 + $0x8] sm:$0xff]  ;;  %v387_v13 = vld [vmem:[%s1986_s9 + $0x18] sm:$0xff]  ;;  %v388_v15 = vld [vmem:[%s1986_s9 + $0x20] sm:$0xff] }
  0x2b   : > { %1441 = vmatpush3.bf16.xpose.msk.msra.mxu0 %vm1856_vm1, %v1436_v6  ;;  %v1478_v12 = vpack.c.bf16 %v385_v10, %v384_v9  ;;  %v389_v16 = vld [vmem:[%s1986_s9 + $0x28] sm:$0xff]  ;;  %v390_v18 = vld [vmem:[%s1986_s9 + $0x30] sm:$0xff]  ;;  %v391_v19 = vld [vmem:[%s1986_s9 + $0x38] sm:$0xff] }
  0x2c   : > { %1444 = vmatprep.subr.msk.bf16.mxu0 %vm1856_vm1, %v1442_v11 }
  0x2d   : > { %1479 = vmatprep.subr.bf16.mxu1 %v1478_v12 }
  0x2e   : > { %1481 = vmatpush3.bf16.msra.mxu1 %v1478_v12 }
  0x33   : > { %1447 = vmatpush3.bf16.xpose.msk.msra.mxu0 %vm1856_vm1, %v1442_v11  ;;  %v386_v11 = vld [vmem:[%s1986_s9 + $0x10] sm:$0xff] }
  0x34   : > { %1450 = vmatprep.subr.msk.bf16.mxu0 %vm1856_vm1, %v1448_v14 }
  0x3b   : > { %1453 = vmatpush3.bf16.xpose.msk.msra.mxu0 %vm1856_vm1, %v1448_v14  ;;  %v1482_v14 = vpack.c.bf16 %v387_v13, %v386_v11  ;;  %v393_v11 = vld [vmem:[%s1986_s9 + $0x48] sm:$0xff] }
  0x3c   : > { %1456 = vmatprep.subr.msk.bf16.mxu0 %vm1856_vm1, %v1454_v17 }
  0x3d   : > { %1483 = vmatprep.subr.bf16.mxu1 %v1482_v14 }
  0x3e   : > { %1485 = vmatpush3.bf16.msra.mxu1 %v1482_v14 }
  0x43   : > { %1459 = vmatpush3.bf16.xpose.msk.msra.mxu0 %vm1856_vm1, %v1454_v17  ;;  %v1486_v17 = vpack.c.bf16 %v389_v16, %v388_v15 }
  0x44   : > { %1462 = vmatprep.subr.msk.bf16.mxu0 %vm1856_vm1, %v1460_v20 }
  0x45   : > { %1487 = vmatprep.subr.bf16.mxu1 %v1486_v17 }
  0x46   : > { %1489 = vmatpush3.bf16.msra.mxu1 %v1486_v17 }
  0x4b   : > { %1465 = vmatpush3.bf16.xpose.msk.msra.mxu0 %vm1856_vm1, %v1460_v20  ;;  %v1490_v20 = vpack.c.bf16 %v391_v19, %v390_v18  ;;  %v395_v18 = vld [vmem:[%s1986_s9 + $0x58] sm:$0xff] }
  0x4c   : > { %1468 = vmatprep.subr.msk.bf16.mxu0 %vm1856_vm1, %v1466_v23 }
  0x4d   : > { %1491 = vmatprep.subr.bf16.mxu1 %v1490_v20 }
  0x4e   : > { %1493 = vmatpush3.bf16.msra.mxu1 %v1490_v20 }
  0x53   : > { %1471 = vmatpush3.bf16.xpose.msk.msra.mxu0 %vm1856_vm1, %v1466_v23 }
  0x54   : > { %1474 = vmatprep.subr.msk.bf16.mxu0 %vm1856_vm1, %v1472_v26 }
  0x5b   : > { %1477 = vmatpush3.bf16.xpose.msk.msra.mxu0 %vm1856_vm1, %v1472_v26 }
  0x62   : > { %1351 = vmatmul.mubr.msk.f32.vlgmr.msra.gmra.mrb[0].mxu0 %vm416_vm0, %v401_v29 }
  0x63   : > { %1353 = vmatprep.mubr.msk.f32.mxu0 %vm416_vm0, %v402_v30 }
  0x66   : > { %1354 = vmatmul.mubr.msk.f32.gmra.mrb[2].mxu0 %vm416_vm0, %v403_v33 }
  0x67   : > { %1356 = vmatprep.mubr.msk.f32.mxu0 %vm416_vm0, %v404_v34 }
  0x6a   : > { %1357 = vmatmul.mubr.msk.f32.gmra.mrb[4].mxu0 %vm416_vm0, %v405_v37 }
  0x6b   : > { %1359 = vmatprep.mubr.msk.f32.mxu0 %vm416_vm0, %v406_v38 }
  0x6e   : > { %1360 = vmatmul.mubr.msk.f32.gmra.mrb[6].mxu0 %vm416_vm0, %v407_v41 }
  0x6f   : > { %1362 = vmatprep.mubr.msk.f32.mxu0 %vm416_vm0, %v408_v42 }
  0x72   : > { %1363 = vmatmul.mubr.msk.f32.gmra.mrb[8].mxu0 %vm416_vm0, %v409_v45 }
  0x73   : > { %1365 = vmatprep.mubr.msk.f32.mxu0 %vm416_vm0, %v410_v46 }
  0x76   : > { %1366 = vmatmul.mubr.msk.f32.gmra.mrb[10].mxu0 %vm416_vm0, %v411_v49 }
  0x77   : > { %1368 = vmatprep.mubr.msk.f32.mxu0 %vm416_vm0, %v412_v50 }
  0x7a   : > { %1369 = vmatmul.mubr.msk.f32.gmra.mrb[12].mxu0 %vm416_vm0, %v413_v53 }
  0x7b   : > { %1371 = vmatprep.mubr.msk.f32.mxu0 %vm416_vm0, %v414_v54 }
  0x7e   : > { %1372 = vmatmul.mubr.msk.f32.gmra.mrb[14].mxu0 %vm416_vm0, %v415_v56 }
 0x135   : > { %v1352_v57 = vpop.f32.mrb[0].mxu0 }
 0x136   : > { %v579_v58 = vpop.f32.mrb[1].mxu0 }
 0x137   : > { %658 = vmax.xlane.f32.xlu0 %v579_v58 }
 0x139   : > { %v1946_v59 = vpop.f32.mrb[2].mxu0 }
 0x13a   : > { %v589_v60 = vpop.f32.mrb[3].mxu0 }
 0x13b   : > { %660 = vmax.xlane.f32.xlu0 %v1352_v57  ;;  %662 = vmax.xlane.f32.xlu1 %v589_v60 }
 0x13d   : > { %v1948_v61 = vpop.f32.mrb[4].mxu0 }
 0x13e   : > { %v599_v62 = vpop.f32.mrb[5].mxu0 }
 0x13f   : > { %664 = vmax.xlane.f32.xlu1 %v1946_v59  ;;  %666 = vmax.xlane.f32.xlu0 %v599_v62 }
 0x141   : > { %v1951_v63 = vpop.f32.mrb[6].mxu0 }
 0x142   : > { %v1953_v0 = vpop.f32.mrb[7].mxu0 }
 0x143   : > { %668 = vmax.xlane.f32.xlu1 %v1948_v61  ;;  %670 = vmax.xlane.f32.xlu0 %v1953_v0 }
 0x145   : > { %v1957_v1 = vpop.f32.mrb[8].mxu0 }
 0x146   : > { %v1959_v2 = vpop.f32.mrb[9].mxu0 }
 0x147   : > { %672 = vmax.xlane.f32.xlu1 %v1951_v63  ;;  %674 = vmax.xlane.f32.xlu0 %v1959_v2 }
 0x149   : > { %v1963_v3 = vpop.f32.mrb[10].mxu0 }
 0x14a   : > { %v1965_v4 = vpop.f32.mrb[11].mxu0 }
 0x14b   : > { %676 = vmax.xlane.f32.xlu1 %v1957_v1  ;;  %678 = vmax.xlane.f32.xlu0 %v1965_v4 }
 0x14d   : > { %v1969_v5 = vpop.f32.mrb[12].mxu0 }
 0x14e   : > { %v1971_v6 = vpop.f32.mrb[13].mxu0 }
 0x14f   : > { %680 = vmax.xlane.f32.xlu1 %v1963_v3  ;;  %682 = vmax.xlane.f32.xlu0 %v1971_v6 }
 0x151   : > { %v1975_v7 = vpop.f32.mrb[14].mxu0 }
 0x152   : > { %v1977_v8 = vpop.f32.mrb[15].mxu0 }
 0x153   : > { %684 = vmax.xlane.f32.xlu1 %v1969_v5  ;;  %686 = vmax.xlane.f32.xlu0 %v1977_v8 }
 0x157   : > { %688 = vmax.xlane.f32.xlu1 %v1975_v7 }
 0x1c4   : > { %v659_v21 = vpop.xlane.xlu0 %658 }
 0x1c5   : > { %v690_v22 = vsub.f32 %v579_v58, %v659_v21 }
 0x1c7   : > { %v706_v23 = vmul.f32 1.442695, %v690_v22 }
 0x1c8   : > { %v661_v24 = vpop.xlane.xlu0 %660  ;;  %v663_v25 = vpop.xlane.xlu1 %662 }
 0x1c9   : > { %1583 = vpow2.f32 %v706_v23  ;;  %v691_v26 = vsub.f32 %v1352_v57, %v661_v24  ;;  %v692_v27 = vsub.f32 %v589_v60, %v663_v25  ;;  %v397_v23 = vld [vmem:[%s1986_s9 + $0x68] sm:$0xff] }
 0x1cb   : > { %v708_v28 = vmul.f32 1.442695, %v691_v26  ;;  %v710_v29 = vmul.f32 1.442695, %v692_v27  ;;  %v398_v27 = vld [vmem:[%s1986_s9 + $0x70] sm:$0xff] }
 0x1cc   : > { %v665_v30 = vpop.xlane.xlu1 %664  ;;  %v667_v31 = vpop.xlane.xlu0 %666 }
 0x1cd   : > { %1585 = vpow2.f32 %v708_v28  ;;  %v693_v32 = vsub.f32 %v1946_v59, %v665_v30  ;;  %v694_v33 = vsub.f32 %v599_v62, %v667_v31  ;;  %v399_v28 = vld [vmem:[%s1986_s9 + $0x78] sm:$0xff] }
 0x1ce   : > { %1587 = vpow2.f32 %v710_v29  ;;  %v1506_v29 = vpack.c.bf16 %v399_v28, %v398_v27 }
 0x1cf   : > { %v712_v34 = vmul.f32 1.442695, %v693_v32  ;;  %v714_v35 = vmul.f32 1.442695, %v694_v33 }
 0x1d0   : > { %v669_v36 = vpop.xlane.xlu1 %668  ;;  %v671_v37 = vpop.xlane.xlu0 %670 }
 0x1d1   : > { %1589 = vpow2.f32 %v712_v34  ;;  %v695_v38 = vsub.f32 %v1948_v61, %v669_v36  ;;  %v696_v39 = vsub.f32 %v1953_v0, %v671_v37 }
 0x1d2   : > { %1591 = vpow2.f32 %v714_v35 }
 0x1d3   : > { %v1999_v40 = vpop.eup %1583  ;;  %v716_v41 = vmul.f32 1.442695, %v695_v38  ;;  %v718_v42 = vmul.f32 1.442695, %v696_v39 }
 0x1d4   : > { %v673_v43 = vpop.xlane.xlu1 %672  ;;  %v675_v44 = vpop.xlane.xlu0 %674  ;;  %738 = vadd.xlane.f32.xlu0 %v1999_v40 }
 0x1d5   : > { %1593 = vpow2.f32 %v716_v41  ;;  %v697_v45 = vsub.f32 %v1951_v63, %v673_v43  ;;  %v698_v46 = vsub.f32 %v1959_v2, %v675_v44 }
 0x1d6   : > { %1595 = vpow2.f32 %v718_v42 }
 0x1d7   : > { %v2004_v47 = vpop.eup %1585  ;;  %v720_v48 = vmul.f32 1.442695, %v697_v45  ;;  %v722_v49 = vmul.f32 1.442695, %v698_v46 }
 0x1d8   : > { %v2006_v50 = vpop.eup %1587  ;;  %v677_v51 = vpop.xlane.xlu1 %676  ;;  %740 = vadd.xlane.f32.xlu1 %v2004_v47 }
 0x1d9   : > { %v679_v52 = vpop.xlane.xlu0 %678  ;;  %1597 = vpow2.f32 %v720_v48  ;;  %v699_v53 = vsub.f32 %v1957_v1, %v677_v51  ;;  %742 = vadd.xlane.f32.xlu0 %v2006_v50 }
 0x1da   : > { %v700_v54 = vsub.f32 %v1965_v4, %v679_v52  ;;  %1599 = vpow2.f32 %v722_v49 }
 0x1db   : > { %v2012_v55 = vpop.eup %1589  ;;  %v724_v56 = vmul.f32 1.442695, %v699_v53 }
 0x1dc   : > { %v726_v57 = vmul.f32 1.442695, %v700_v54  ;;  %v2014_v58 = vpop.eup %1591  ;;  %v681_v59 = vpop.xlane.xlu1 %680  ;;  %744 = vadd.xlane.f32.xlu1 %v2012_v55 }
 0x1dd   : > { %v683_v60 = vpop.xlane.xlu0 %682  ;;  %1601 = vpow2.f32 %v724_v56  ;;  %v701_v61 = vsub.f32 %v1963_v3, %v681_v59  ;;  %746 = vadd.xlane.f32.xlu0 %v2014_v58 }
 0x1de   : > { %v702_v62 = vsub.f32 %v1971_v6, %v683_v60  ;;  %1603 = vpow2.f32 %v726_v57  ;;  %v392_v6 = vld [vmem:[%s1986_s9 + $0x40] sm:$0xff] }
 0x1df   : > { %v2020_v63 = vpop.eup %1593  ;;  %v728_v0 = vmul.f32 1.442695, %v701_v61  ;;  %v1494_v12 = vpack.c.bf16 %v393_v11, %v392_v6 }
 0x1e0   : > { %v730_v1 = vmul.f32 1.442695, %v702_v62  ;;  %v2022_v2 = vpop.eup %1595  ;;  %v685_v4 = vpop.xlane.xlu1 %684  ;;  %748 = vadd.xlane.f32.xlu1 %v2020_v63 }
 0x1e1   : > { %v687_v9 = vpop.xlane.xlu0 %686  ;;  %1605 = vpow2.f32 %v728_v0  ;;  %v703_v10 = vsub.f32 %v1969_v5, %v685_v4  ;;  %750 = vadd.xlane.f32.xlu0 %v2022_v2  ;;  %1495 = vmatprep.subr.bf16.mxu1 %v1494_v12 }
 0x1e2   : > { %v704_v3 = vsub.f32 %v1977_v8, %v687_v9  ;;  %1607 = vpow2.f32 %v730_v1  ;;  %1497 = vmatpush3.bf16.msra.mxu1 %v1494_v12  ;;  %v394_v8 = vld [vmem:[%s1986_s9 + $0x50] sm:$0xff] }
 0x1e3   : > { %v2030_v13 = vpop.eup %1597  ;;  %v732_v14 = vmul.f32 1.442695, %v703_v10  ;;  %v1498_v19 = vpack.c.bf16 %v395_v18, %v394_v8 }
 0x1e4   : > { %v734_v15 = vmul.f32 1.442695, %v704_v3  ;;  %v2032_v16 = vpop.eup %1599  ;;  %752 = vadd.xlane.f32.xlu1 %v2030_v13  ;;  %v689_v17 = vpop.xlane.xlu1 %688 }
 0x1e5   : > { %1609 = vpow2.f32 %v732_v14  ;;  %v705_v5 = vsub.f32 %v1975_v7, %v689_v17  ;;  %754 = vadd.xlane.f32.xlu0 %v2032_v16  ;;  %1499 = vmatprep.subr.bf16.mxu1 %v1498_v19  ;;  %v396_v7 = vld [vmem:[%s1986_s9 + $0x60] sm:$0xff]  ;;  %s2113_s9 = scalar_lea.sflag [#allocation3], %s302_s10 }
 0x1e6   : > { %1611 = vpow2.f32 %v734_v15  ;;  %1501 = vmatpush3.bf16.msra.mxu1 %v1498_v19  ;;  %v1502_v24 = vpack.c.bf16 %v397_v23, %v396_v7 }
 0x1e7   : > { %v2039_v20 = vpop.eup %1601  ;;  %v736_v21 = vmul.f32 1.442695, %v705_v5 }
 0x1e8   : > { %v2041_v22 = vpop.eup %1603  ;;  %756 = vadd.xlane.f32.xlu1 %v2039_v20  ;;  %1503 = vmatprep.subr.bf16.mxu1 %v1502_v24 }
 0x1e9   : > { %1613 = vpow2.f32 %v736_v21  ;;  %758 = vadd.xlane.f32.xlu0 %v2041_v22 }
 0x1ea   : > { %1505 = vmatpush3.bf16.msra.mxu1 %v1502_v24 }
 0x1eb   : > { %v2047_v25 = vpop.eup %1605  ;;  %1507 = vmatprep.subr.bf16.mxu1 %v1506_v29 }
 0x1ec   : > { %v2049_v26 = vpop.eup %1607  ;;  %760 = vadd.xlane.f32.xlu1 %v2047_v25 }
 0x1ed   : > { %762 = vadd.xlane.f32.xlu0 %v2049_v26 }
 0x1ee   : > { %1509 = vmatpush3.bf16.msra.mxu1 %v1506_v29 }
 0x1ef   : > { %v2055_v30 = vpop.eup %1609 }
 0x1f0   : > { %v2057_v31 = vpop.eup %1611  ;;  %764 = vadd.xlane.f32.xlu1 %v2055_v30 }
 0x1f1   : > { %766 = vadd.xlane.f32.xlu0 %v2057_v31 }
 0x1f3   : > { %v2061_v32 = vpop.eup %1613 }
 0x1f4   : > { %768 = vadd.xlane.f32.xlu1 %v2061_v32 }
 0x261   : > { %v739_v33 = vpop.xlane.xlu0 %738 }
 0x262   : > { %1615 = vrcp.f32 %v739_v33 }
 0x265   : > { %v741_v34 = vpop.xlane.xlu1 %740 }
 0x266   : > { %1617 = vrcp.f32 %v741_v34  ;;  %v743_v35 = vpop.xlane.xlu0 %742 }
 0x267   : > { %1619 = vrcp.f32 %v743_v35 }
 0x269   : > { %v745_v36 = vpop.xlane.xlu1 %744 }
 0x26a   : > { %1621 = vrcp.f32 %v745_v36  ;;  %v747_v37 = vpop.xlane.xlu0 %746 }
 0x26b   : > { %1623 = vrcp.f32 %v747_v37 }
 0x26c   : > { %v1616_v38 = vpop.eup %1615 }
 0x26d   : > { %v749_v39 = vpop.xlane.xlu1 %748  ;;  %v786_v41 = vmul.f32 %v1616_v38, %v1999_v40 }
 0x26e   : > { %1625 = vrcp.f32 %v749_v39  ;;  %v751_v42 = vpop.xlane.xlu0 %750 }
 0x26f   : > { %1627 = vrcp.f32 %v751_v42  ;;  %802 = vst [vmem:[%s2068_s12] sm:$0xff] %v786_v41  ;;  %1406 = vmatprep.mubr.f32.mxu1 %v786_v41 }
 0x270   : > { %v1618_v43 = vpop.eup %1617 }
 0x271   : > { %v1620_v44 = vpop.eup %1619  ;;  %v753_v45 = vpop.xlane.xlu1 %752  ;;  %v787_v46 = vmul.f32 %v1618_v43, %v2004_v47 }
 0x272   : > { %1629 = vrcp.f32 %v753_v45  ;;  %v755_v48 = vpop.xlane.xlu0 %754  ;;  %v788_v40 = vmul.f32 %v1620_v44, %v2006_v50 }
 0x273   : > { %1631 = vrcp.f32 %v755_v48  ;;  %803 = vst [vmem:[%s2068_s12 + $0x8] sm:$0xff] %v787_v46  ;;  %1407 = vmatmul.mubr.f32.vlgmr.msra.gmra.mrb[0].mxu1 %v787_v46 }
 0x274   : > { %v1622_v49 = vpop.eup %1621  ;;  %804 = vst [vmem:[%s2068_s12 + $0x10] sm:$0xff] %v788_v40  ;;  %1409 = vmatprep.mubr.f32.mxu1 %v788_v40 }
 0x275   : > { %v1624_v51 = vpop.eup %1623  ;;  %v757_v52 = vpop.xlane.xlu1 %756  ;;  %v789_v53 = vmul.f32 %v1622_v49, %v2012_v55 }
 0x276   : > { %1633 = vrcp.f32 %v757_v52  ;;  %v759_v54 = vpop.xlane.xlu0 %758  ;;  %v790_v47 = vmul.f32 %v1624_v51, %v2014_v58 }
 0x277   : > { %1635 = vrcp.f32 %v759_v54  ;;  %805 = vst [vmem:[%s2068_s12 + $0x18] sm:$0xff] %v789_v53  ;;  %1410 = vmatmul.mubr.f32.gmra.mrb[2].mxu1 %v789_v53 }
 0x278   : > { %v1626_v50 = vpop.eup %1625  ;;  %806 = vst [vmem:[%s2068_s12 + $0x20] sm:$0xff] %v790_v47  ;;  %1412 = vmatprep.mubr.f32.mxu1 %v790_v47 }
 0x279   : > { %v1628_v56 = vpop.eup %1627  ;;  %v761_v57 = vpop.xlane.xlu1 %760  ;;  %v791_v59 = vmul.f32 %v1626_v50, %v2020_v63 }
 0x27a   : > { %1637 = vrcp.f32 %v761_v57  ;;  %v763_v60 = vpop.xlane.xlu0 %762  ;;  %v792_v55 = vmul.f32 %v1628_v56, %v2022_v2 }
 0x27b   : > { %1639 = vrcp.f32 %v763_v60  ;;  %807 = vst [vmem:[%s2068_s12 + $0x28] sm:$0xff] %v791_v59  ;;  %1413 = vmatmul.mubr.f32.gmra.mrb[4].mxu1 %v791_v59 }
 0x27c   : > { %v1630_v58 = vpop.eup %1629  ;;  %808 = vst [vmem:[%s2068_s12 + $0x30] sm:$0xff] %v792_v55  ;;  %1415 = vmatprep.mubr.f32.mxu1 %v792_v55 }
 0x27d   : > { %v1632_v61 = vpop.eup %1631  ;;  %v765_v62 = vpop.xlane.xlu1 %764  ;;  %v793_v0 = vmul.f32 %v1630_v58, %v2030_v13 }
 0x27e   : > { %1641 = vrcp.f32 %v765_v62  ;;  %v767_v1 = vpop.xlane.xlu0 %766  ;;  %v794_v63 = vmul.f32 %v1632_v61, %v2032_v16 }
 0x27f   : > { %1643 = vrcp.f32 %v767_v1  ;;  %809 = vst [vmem:[%s2068_s12 + $0x38] sm:$0xff] %v793_v0  ;;  %1416 = vmatmul.mubr.f32.gmra.mrb[6].mxu1 %v793_v0 }
 0x280   : > { %v1634_v2 = vpop.eup %1633  ;;  %810 = vst [vmem:[%s2068_s12 + $0x40] sm:$0xff] %v794_v63  ;;  %1418 = vmatprep.mubr.f32.mxu1 %v794_v63 }
 0x281   : > { %v1636_v4 = vpop.eup %1635  ;;  %v769_v9 = vpop.xlane.xlu1 %768  ;;  %v795_v10 = vmul.f32 %v1634_v2, %v2039_v20 }
 0x282   : > { %1645 = vrcp.f32 %v769_v9  ;;  %v796_v3 = vmul.f32 %v1636_v4, %v2041_v22 }
 0x283   : > { %811 = vst [vmem:[%s2068_s12 + $0x48] sm:$0xff] %v795_v10  ;;  %1419 = vmatmul.mubr.f32.gmra.mrb[8].mxu1 %v795_v10 }
 0x284   : > { %v1638_v6 = vpop.eup %1637  ;;  %812 = vst [vmem:[%s2068_s12 + $0x50] sm:$0xff] %v796_v3  ;;  %1421 = vmatprep.mubr.f32.mxu1 %v796_v3 }
 0x285   : > { %v1640_v11 = vpop.eup %1639  ;;  %v797_v12 = vmul.f32 %v1638_v6, %v2047_v25 }
 0x286   : > { %v798_v13 = vmul.f32 %v1640_v11, %v2049_v26 }
 0x287   : > { %813 = vst [vmem:[%s2068_s12 + $0x58] sm:$0xff] %v797_v12  ;;  %1422 = vmatmul.mubr.f32.gmra.mrb[10].mxu1 %v797_v12 }
 0x288   : > { %v1642_v14 = vpop.eup %1641  ;;  %814 = vst [vmem:[%s2068_s12 + $0x60] sm:$0xff] %v798_v13  ;;  %1424 = vmatprep.mubr.f32.mxu1 %v798_v13 }
 0x289   : > { %v1644_v15 = vpop.eup %1643  ;;  %v799_v16 = vmul.f32 %v1642_v14, %v2055_v30 }
 0x28a   : > { %v800_v17 = vmul.f32 %v1644_v15, %v2057_v31 }
 0x28b   : > { %815 = vst [vmem:[%s2068_s12 + $0x68] sm:$0xff] %v799_v16  ;;  %1425 = vmatmul.mubr.f32.gmra.mrb[12].mxu1 %v799_v16 }
 0x28c   : > { %v1646_v5 = vpop.eup %1645  ;;  %816 = vst [vmem:[%s2068_s12 + $0x70] sm:$0xff] %v800_v17  ;;  %1427 = vmatprep.mubr.f32.mxu1 %v800_v17 }
 0x28d   : > { %v801_v8 = vmul.f32 %v1646_v5, %v2061_v32 }
 0x28f   : > { %817 = vst [vmem:[%s2068_s12 + $0x78] sm:$0xff] %v801_v8  ;;  %1428 = vmatmul.mubr.f32.gmra.mrb[14].mxu1 %v801_v8  ;;  %s1653_s12 = scalar_lea.vmem %s1652_s19, 4096 }
 0x290   : > { %p1655_p5 = scmp.lt.s32.totalorder %s1653_s12, %s1647_s11 }
 0x292   : > { %p1656_p6 = por %p1655_p5, %p1654_p4 }
 0x294   : > { %p1657_p7 = pnand %p1656_p6, %p1650_p2 }
 0x296   : > { %1660 = shalt.err (!%p1657_p7)
}
 0x297   : > { %s1661_s10 = scalar_lea.hbm %s2107_s8, 2048  ;;  %s1665_s24 = scalar_lea.hbm %s2207_s4, 16384 }
 0x298   : > { %p1662_p9 = scmp.ne.s32.totalorder %s2107_s8, %s1661_s10  ;;  %p1666_p12 = scmp.lt.u32.totalorder %s2107_s8, %s2207_s4 }
 0x299   : > { %p1667_p13 = scmp.lt.u32.totalorder %s1665_s24, %s1661_s10  ;;  %p1669_p1 = scmp.lt.u32.totalorder %s1661_s10, %s2107_s8 }
 0x29a   : > { %p1663_p10 = pnand %p1662_p9, %p1822_p3 }
 0x29b   : > { %p1668_p0 = por %p1667_p13, %p1666_p12 }
 0x29c   : > { %p1664_p11 = pneg %p1663_p10 }
 0x29d   : > { %p1670_p2 = por %p1669_p1, %p1668_p0 }
 0x29f   : > { %p1671_p4 = pnand %p1670_p2, %p1664_p11 }
 0x2a1   : > { %1674 = shalt.err (!%p1671_p4)
}
 0x2a2   : > { %s1744_s6 = smov 128   ;;  %s1745_s11 = smov 8  }
 0x2a3   : > { %1510 = dma.vmem_to_hbm [thread:$0]  (%p1822_p3), %s2109_s30, 2048, %s2107_s8, %s2113_s9, %s1744_s6, %s1744_s6, %s1745_s11  }
 0x2a4   : > { %s2141_s12 = scalar_lea.vmem %s2206_s3, %s1846_s13 }
 0x346   : > { %v1408_v18 = vpop.f32.mrb[0].mxu1 }
 0x347   : > { %964 = vst.msk [vmem:[%s2141_s12 + $0x8] sm:$0xff] %vm416_vm0, %v1408_v18  ;;  %v884_v19 = vpop.f32.mrb[1].mxu1 }
 0x348   : > { %963 = vst.msk [vmem:[%s2141_s12] sm:$0xff] %vm416_vm0, %v884_v19 }
 0x34a   : > { %v1411_v20 = vpop.f32.mrb[2].mxu1 }
 0x34b   : > { %966 = vst.msk [vmem:[%s2141_s12 + $0x18] sm:$0xff] %vm416_vm0, %v1411_v20  ;;  %v894_v21 = vpop.f32.mrb[3].mxu1 }
 0x34c   : > { %965 = vst.msk [vmem:[%s2141_s12 + $0x10] sm:$0xff] %vm416_vm0, %v894_v21 }
 0x34e   : > { %v1414_v22 = vpop.f32.mrb[4].mxu1 }
 0x34f   : > { %968 = vst.msk [vmem:[%s2141_s12 + $0x28] sm:$0xff] %vm416_vm0, %v1414_v22  ;;  %v904_v7 = vpop.f32.mrb[5].mxu1 }
 0x350   : > { %967 = vst.msk [vmem:[%s2141_s12 + $0x20] sm:$0xff] %vm416_vm0, %v904_v7 }
 0x352   : > { %v1417_v23 = vpop.f32.mrb[6].mxu1 }
 0x353   : > { %970 = vst.msk [vmem:[%s2141_s12 + $0x38] sm:$0xff] %vm416_vm0, %v1417_v23  ;;  %v914_v24 = vpop.f32.mrb[7].mxu1 }
 0x354   : > { %969 = vst.msk [vmem:[%s2141_s12 + $0x30] sm:$0xff] %vm416_vm0, %v914_v24 }
 0x356   : > { %v1420_v25 = vpop.f32.mrb[8].mxu1 }
 0x357   : > { %972 = vst.msk [vmem:[%s2141_s12 + $0x48] sm:$0xff] %vm416_vm0, %v1420_v25  ;;  %v924_v26 = vpop.f32.mrb[9].mxu1 }
 0x358   : > { %971 = vst.msk [vmem:[%s2141_s12 + $0x40] sm:$0xff] %vm416_vm0, %v924_v26 }
 0x35a   : > { %v1423_v27 = vpop.f32.mrb[10].mxu1 }
 0x35b   : > { %974 = vst.msk [vmem:[%s2141_s12 + $0x58] sm:$0xff] %vm416_vm0, %v1423_v27  ;;  %v934_v28 = vpop.f32.mrb[11].mxu1 }
 0x35c   : > { %973 = vst.msk [vmem:[%s2141_s12 + $0x50] sm:$0xff] %vm416_vm0, %v934_v28 }
 0x35e   : > { %v1426_v29 = vpop.f32.mrb[12].mxu1 }
 0x35f   : > { %976 = vst.msk [vmem:[%s2141_s12 + $0x68] sm:$0xff] %vm416_vm0, %v1426_v29  ;;  %v944_v30 = vpop.f32.mrb[13].mxu1 }
 0x360   : > { %975 = vst.msk [vmem:[%s2141_s12 + $0x60] sm:$0xff] %vm416_vm0, %v944_v30 }
 0x362   : > { %v1429_v31 = vpop.f32.mrb[14].mxu1 }
 0x363   : > { %978 = vst.msk [vmem:[%s2141_s12 + $0x78] sm:$0xff] %vm416_vm0, %v1429_v31  ;;  %v954_v32 = vpop.f32.mrb[15].mxu1 }
 0x364   : > { %977 = vst.msk [vmem:[%s2141_s12 + $0x70] sm:$0xff] %vm416_vm0, %v954_v32 }
 0x365 PF: > { %p1516_p3 = scmp.ge.s32.totalorder %s1741_s22, 2  ;;  %s1045_s28 = sand.u32 1, %s1713_s15  }
 0x366   : > { %s1046_s13 = scalar_lea.sflag [#allocation3], %s1045_s28 }
 0x367   : > { %p1513_p5 = pnand %p1516_p3, %p1831_p8 }
 0x369   : > { %1708 = dma.done.wait (!%p1513_p5), %s1046_s13, 2048  }
 0x36a   : > { %1710 = vsyncadd (!%p1513_p5), %s1046_s13, 4294965248  ;;  %s18_s22 = sadd.s32 1, %s1741_s22   ;;  %s2212_s15 = smov %s1717_s16 }
 0x36b   : > { %p15_p6 = scmp.ge.s32.totalorder %s18_s22, 10   ;;  %s2213_s16 = smov %s1721_s17 }
 0x36c   : > { %s2214_s17 = smov %s1840_s7  ;;  %s2215_s18 = smov %s1733_s20 }
 0x36d   : > { %s2216_s19 = smov %s1737_s21  ;;  %s2217_s20 = smov %s2220_s25 }
 0x36e   : > { %s2218_s21 = smov %s2224_s26  ;;  %17 = sbr.rel (!%p15_p6) target bundleno = 5 (0x5), region = 85 }
 0x375   :  { %1051 = vsyncpa [#allocation3], 1 }
 0x376   :  { %1053 = vsyncpa [#allocation3 + $0x1], 1 }

</bundles_post_ra>
